<compile_context>
chip_gen: v6e
topology: v6e:2x2x1
jax: 0.10.0
libtpu: 0.0.40
codegen_flags: <defaults>
</compile_context>

<pallas_src>
import functools

import jax
import jax.numpy as jnp
from jax.experimental import pallas as pl
from jax.experimental.pallas import tpu as pltpu


NEG_SLOPE = 0.05   # nn.LeakyReLU(0.05)
SUBLANE = 8        # TPU sublane width


def _round_up(x, m):
    return (x + m - 1) // m * m


def _leaky_relu(h):
    return jnp.where(h > 0, h, NEG_SLOPE * h)


def mlp_coder_kernel(x_ref,
                     w0_ref, b0_ref,
                     w1_ref, b1_ref,
                     w2_ref, b2_ref,
                     o_ref):
    """Fused (Linear -> LeakyReLU(0.05)) x 3 on one row tile.

    x arrives as raw f32 and is cast to bf16 in-kernel; weights are bf16 MXU
    operands; accumulation, bias add and the activation are f32.
    """
    x = x_ref[...].astype(jnp.bfloat16)
    # layer_0
    h = jnp.dot(x, w0_ref[...], preferred_element_type=jnp.float32) + b0_ref[...]
    h = _leaky_relu(h)
    # layer_1
    h = jnp.dot(h.astype(jnp.bfloat16), w1_ref[...],
                preferred_element_type=jnp.float32) + b1_ref[...]
    h = _leaky_relu(h)
    # output_layer (Linear -> LeakyReLU; dropout=None in the reference module)
    h = jnp.dot(h.astype(jnp.bfloat16), w2_ref[...],
                preferred_element_type=jnp.float32) + b2_ref[...]
    h = _leaky_relu(h)
    o_ref[...] = h.astype(o_ref.dtype)


def init_mlp_coder_params(key, in_channels, out_channels, layer_dims):
    """Deterministic parameter init (uniform +-1/sqrt(fan_in), like nn.Linear)."""
    dims = [21 * in_channels] + list(layer_dims) + [21 * out_channels]
    params = []
    for d_in, d_out in zip(dims[:-1], dims[1:]):
        key, kw, kb = jax.random.split(key, 3)
        bound = 1.0 / jnp.sqrt(jnp.float32(d_in))
        w = jax.random.uniform(kw, (d_in, d_out), jnp.float32, -bound, bound)
        b = jax.random.uniform(kb, (1, d_out), jnp.float32, -bound, bound)
        params.append((w, b))
    return params


def prepare_params(params):
    """One-time (outside jit) cast: weights -> bf16 MXU operands, biases -> f32.

    No shape padding is needed: the kernel consumes the true, unpadded dims.
    """
    return tuple((w.astype(jnp.bfloat16), b.astype(jnp.float32)) for w, b in params)


@functools.partial(jax.jit, static_argnames=("in_channels", "out_channels", "row_tile"))
def mlp_coder_forward(x, params, in_channels, out_channels, row_tile=2048):
    """x: (B, 21, in_channels) float32 -> (B, 21, out_channels) float32."""
    n_in = 21 * in_channels
    n_out = 21 * out_channels

    x2d = x.reshape(-1, n_in)
    n_rows = x2d.shape[0]

    (w0, b0), (w1, b1), (w2, b2) = params
    h0 = w0.shape[1]
    h1 = w1.shape[1]

    # Row tile: large by default (amortizes ~0.35us/step pipeline overhead), rounded
    # to a sublane multiple, and capped near rows/2 so the "parallel" axis has >= 2
    # steps for v7x's two TensorCores.  cdiv grid; Pallas masks the partial last
    # block, so no row padding / extra copy passes are needed.
    half_rows = _round_up(max(pl.cdiv(n_rows, 2), SUBLANE), SUBLANE)
    tm = min(_round_up(row_tile, SUBLANE), half_rows)
    grid = (pl.cdiv(n_rows, tm),)

    const = lambda i: (0, 0)                     # weights/biases: VMEM-resident
    in_specs = [
        pl.BlockSpec((tm, n_in), lambda i: (i, 0)),   # x: streamed raw f32 rows
        pl.BlockSpec(w0.shape, const),
        pl.BlockSpec(b0.shape, const),
        pl.BlockSpec(w1.shape, const),
        pl.BlockSpec(b1.shape, const),
        pl.BlockSpec(w2.shape, const),
        pl.BlockSpec(b2.shape, const),
    ]
    out_spec = pl.BlockSpec((tm, n_out), lambda i: (i, 0))   # true-width f32 output

    flops = 2 * n_rows * (n_in * h0 + h0 * h1 + h1 * n_out)
    param_bytes = sum(int(w.size) * 2 + int(b.size) * 4
                      for w, b in ((w0, b0), (w1, b1), (w2, b2)))
    bytes_accessed = n_rows * n_in * 4 + n_rows * n_out * 4 + param_bytes

    # Double-buffered x/out tiles + (double-buffered) params.  Only raise the scoped
    # VMEM limit when a very large row_tile would exceed v5e's ~16 MiB default.
    footprint = 2 * tm * (n_in + n_out) * 4 + 2 * param_bytes
    vmem_limit = None
    if footprint > 12 * 1024 * 1024:
        vmem_limit = min(footprint + (4 << 20), 48 << 20)

    out = pl.pallas_call(
        mlp_coder_kernel,
        out_shape=jax.ShapeDtypeStruct((n_rows, n_out), jnp.float32),
        grid=grid,
        in_specs=in_specs,
        out_specs=out_spec,
        compiler_params=pltpu.CompilerParams(
            dimension_semantics=("parallel",),
            vmem_limit_bytes=vmem_limit),
        cost_estimate=pl.CostEstimate(
            flops=flops, transcendentals=0, bytes_accessed=bytes_accessed),
    )(x2d, w0, b0, w1, b1, w2, b2)

    # Contiguous reshape only — no slicing pass.
    return out.reshape(-1, 21, out_channels)


def mlp_coder_reference(x, params, in_channels, out_channels):
    """Plain-JAX f32 reference matching the PyTorch module."""
    h = x.reshape(-1, 21 * in_channels).astype(jnp.float32)
    for w, b in params:
        h = h @ w + b
        h = jnp.where(h > 0, h, NEG_SLOPE * h)
    return h.reshape(-1, 21, out_channels)


if __name__ == "__main__":
    in_channels = 4
    out_channels = 2
    layer_dims = [32, 64]

    key = jax.random.PRNGKey(0)
    key, kx1, kx2 = jax.random.split(key, 3)

    params = init_mlp_coder_params(key, in_channels, out_channels, layer_dims)
    fast_params = prepare_params(params)   # one-time bf16 cast, hoisted out of jit

    ok = True
    # batch=64 divides the row tile evenly; batch=50 exercises the masked partial
    # last block of the cdiv grid.
    for batch, kx in ((64, kx1), (50, kx2)):
        x = jax.random.normal(kx, (batch, 21, in_channels), jnp.float32)
        out = mlp_coder_forward(x, fast_params, in_channels, out_channels)
        out = jax.block_until_ready(out)
        ref = mlp_coder_reference(x, params, in_channels, out_channels)
        assert out.shape == (batch, 21, out_channels), out.shape
        # bf16 matmul operands with f32 accumulation -> loose tolerance vs f32 ref.
        ok = ok and bool(jnp.allclose(out, ref, atol=3e-2, rtol=3e-2))
    assert ok, "mismatch vs f32 reference"

    print("KERNEL_OK")
</pallas_src>

<mosaic_0001>
module attributes {stable_mosaic.version = 11 : i64} {
  func.func @mlp_coder_kernel(%arg0: i32, %arg1: memref<32x84xf32, #tpu.memory_space<vmem>>, %arg2: memref<84x32xbf16, #tpu.memory_space<vmem>>, %arg3: memref<1x32xf32, #tpu.memory_space<vmem>>, %arg4: memref<32x64xbf16, #tpu.memory_space<vmem>>, %arg5: memref<1x64xf32, #tpu.memory_space<vmem>>, %arg6: memref<64x42xbf16, #tpu.memory_space<vmem>>, %arg7: memref<1x42xf32, #tpu.memory_space<vmem>>, %arg8: memref<32x42xf32, #tpu.memory_space<vmem>>) attributes {dimension_semantics = [#tpu.dimension_semantics<parallel>], iteration_bounds = array<i64: 2>, scalar_prefetch = 0 : i64, scratch_operands = 0 : i64, tpu.core_type = #tpu.core_type<tc>, window_params = [{transform_indices = @transform_0, window_bounds = array<i64: 32, 84>}, {pipeline_mode = #tpu.pipeline_mode<synchronous>, transform_indices = @transform_1, window_bounds = array<i64: 84, 32>}, {pipeline_mode = #tpu.pipeline_mode<synchronous>, transform_indices = @transform_2, window_bounds = array<i64: 1, 32>}, {pipeline_mode = #tpu.pipeline_mode<synchronous>, transform_indices = @transform_3, window_bounds = array<i64: 32, 64>}, {pipeline_mode = #tpu.pipeline_mode<synchronous>, transform_indices = @transform_4, window_bounds = array<i64: 1, 64>}, {pipeline_mode = #tpu.pipeline_mode<synchronous>, transform_indices = @transform_5, window_bounds = array<i64: 64, 42>}, {pipeline_mode = #tpu.pipeline_mode<synchronous>, transform_indices = @transform_6, window_bounds = array<i64: 1, 42>}, {transform_indices = @transform_7, window_bounds = array<i64: 32, 42>}]} {
    %c0 = arith.constant 0 : index
    %c0_0 = arith.constant 0 : index
    %0 = vector.load %arg1[%c0, %c0_0] : memref<32x84xf32, #tpu.memory_space<vmem>>, vector<32x84xf32>
    %1 = arith.truncf %0 : vector<32x84xf32> to vector<32x84xbf16>
    %c0_1 = arith.constant 0 : index
    %c0_2 = arith.constant 0 : index
    %2 = vector.load %arg2[%c0_1, %c0_2] : memref<84x32xbf16, #tpu.memory_space<vmem>>, vector<84x32xbf16>
    %cst = arith.constant dense<0.000000e+00> : vector<32x32xf32>
    %3 = tpu.matmul %1, %2, %cst {dimension_numbers = #tpu.dot_dimension_numbers<[1], [0], [0], [1], [0, 0, 1, 1], [], []>} : vector<32x84xbf16>, vector<84x32xbf16>, vector<32x32xf32> -> vector<32x32xf32>
    %c0_3 = arith.constant 0 : index
    %c0_4 = arith.constant 0 : index
    %4 = vector.load %arg3[%c0_3, %c0_4] : memref<1x32xf32, #tpu.memory_space<vmem>>, vector<1x32xf32>
    %5 = vector.broadcast %4 : vector<1x32xf32> to vector<32x32xf32>
    %6 = arith.addf %3, %5 : vector<32x32xf32>
    %cst_5 = arith.constant 0.000000e+00 : f32
    %7 = vector.broadcast %cst_5 : f32 to vector<32x32xf32>
    %8 = arith.cmpf ogt, %6, %7 : vector<32x32xf32>
    %cst_6 = arith.constant 5.000000e-02 : f32
    %9 = vector.broadcast %cst_6 : f32 to vector<32x32xf32>
    %10 = arith.mulf %9, %6 : vector<32x32xf32>
    %11 = arith.select %8, %6, %10 : vector<32x32xi1>, vector<32x32xf32>
    %12 = arith.truncf %11 : vector<32x32xf32> to vector<32x32xbf16>
    %c0_7 = arith.constant 0 : index
    %c0_8 = arith.constant 0 : index
    %13 = vector.load %arg4[%c0_7, %c0_8] : memref<32x64xbf16, #tpu.memory_space<vmem>>, vector<32x64xbf16>
    %cst_9 = arith.constant dense<0.000000e+00> : vector<32x64xf32>
    %14 = tpu.matmul %12, %13, %cst_9 {dimension_numbers = #tpu.dot_dimension_numbers<[1], [0], [0], [1], [0, 0, 1, 1], [], []>} : vector<32x32xbf16>, vector<32x64xbf16>, vector<32x64xf32> -> vector<32x64xf32>
    %c0_10 = arith.constant 0 : index
    %c0_11 = arith.constant 0 : index
    %15 = vector.load %arg5[%c0_10, %c0_11] : memref<1x64xf32, #tpu.memory_space<vmem>>, vector<1x64xf32>
    %16 = vector.broadcast %15 : vector<1x64xf32> to vector<32x64xf32>
    %17 = arith.addf %14, %16 : vector<32x64xf32>
    %cst_12 = arith.constant 0.000000e+00 : f32
    %18 = vector.broadcast %cst_12 : f32 to vector<32x64xf32>
    %19 = arith.cmpf ogt, %17, %18 : vector<32x64xf32>
    %cst_13 = arith.constant 5.000000e-02 : f32
    %20 = vector.broadcast %cst_13 : f32 to vector<32x64xf32>
    %21 = arith.mulf %20, %17 : vector<32x64xf32>
    %22 = arith.select %19, %17, %21 : vector<32x64xi1>, vector<32x64xf32>
    %23 = arith.truncf %22 : vector<32x64xf32> to vector<32x64xbf16>
    %c0_14 = arith.constant 0 : index
    %c0_15 = arith.constant 0 : index
    %24 = vector.load %arg6[%c0_14, %c0_15] : memref<64x42xbf16, #tpu.memory_space<vmem>>, vector<64x42xbf16>
    %cst_16 = arith.constant dense<0.000000e+00> : vector<32x42xf32>
    %25 = tpu.matmul %23, %24, %cst_16 {dimension_numbers = #tpu.dot_dimension_numbers<[1], [0], [0], [1], [0, 0, 1, 1], [], []>} : vector<32x64xbf16>, vector<64x42xbf16>, vector<32x42xf32> -> vector<32x42xf32>
    %c0_17 = arith.constant 0 : index
    %c0_18 = arith.constant 0 : index
    %26 = vector.load %arg7[%c0_17, %c0_18] : memref<1x42xf32, #tpu.memory_space<vmem>>, vector<1x42xf32>
    %27 = vector.broadcast %26 : vector<1x42xf32> to vector<32x42xf32>
    %28 = arith.addf %25, %27 : vector<32x42xf32>
    %cst_19 = arith.constant 0.000000e+00 : f32
    %29 = vector.broadcast %cst_19 : f32 to vector<32x42xf32>
    %30 = arith.cmpf ogt, %28, %29 : vector<32x42xf32>
    %cst_20 = arith.constant 5.000000e-02 : f32
    %31 = vector.broadcast %cst_20 : f32 to vector<32x42xf32>
    %32 = arith.mulf %31, %28 : vector<32x42xf32>
    %33 = arith.select %30, %28, %32 : vector<32x42xi1>, vector<32x42xf32>
    %c0_21 = arith.constant 0 : index
    %c0_22 = arith.constant 0 : index
    %34 = vector.load %arg8[%c0_21, %c0_22] : memref<32x42xf32, #tpu.memory_space<vmem>>, vector<32x42xf32>
    tpu.vector_store %arg8[%c0_21, %c0_22], %33 {strides = array<i32>} : memref<32x42xf32, #tpu.memory_space<vmem>>, vector<32x42xf32>,
    return
  }
  func.func @transform_0(%arg0: i32) -> (i32, i32) {
    %c0_i32 = arith.constant 0 : i32
    %c0_i32_0 = arith.constant 0 : i32
    return %arg0, %c0_i32 : i32, i32
  }
  func.func @transform_1(%arg0: i32) -> (i32, i32) {
    %c0_i32 = arith.constant 0 : i32
    %c0_i32_0 = arith.constant 0 : i32
    %c0_i32_1 = arith.constant 0 : i32
    return %c0_i32, %c0_i32_0 : i32, i32
  }
  func.func @transform_2(%arg0: i32) -> (i32, i32) {
    %c0_i32 = arith.constant 0 : i32
    %c0_i32_0 = arith.constant 0 : i32
    %c0_i32_1 = arith.constant 0 : i32
    return %c0_i32, %c0_i32_0 : i32, i32
  }
  func.func @transform_3(%arg0: i32) -> (i32, i32) {
    %c0_i32 = arith.constant 0 : i32
    %c0_i32_0 = arith.constant 0 : i32
    %c0_i32_1 = arith.constant 0 : i32
    return %c0_i32, %c0_i32_0 : i32, i32
  }
  func.func @transform_4(%arg0: i32) -> (i32, i32) {
    %c0_i32 = arith.constant 0 : i32
    %c0_i32_0 = arith.constant 0 : i32
    %c0_i32_1 = arith.constant 0 : i32
    return %c0_i32, %c0_i32_0 : i32, i32
  }
  func.func @transform_5(%arg0: i32) -> (i32, i32) {
    %c0_i32 = arith.constant 0 : i32
    %c0_i32_0 = arith.constant 0 : i32
    %c0_i32_1 = arith.constant 0 : i32
    return %c0_i32, %c0_i32_0 : i32, i32
  }
  func.func @transform_6(%arg0: i32) -> (i32, i32) {
    %c0_i32 = arith.constant 0 : i32
    %c0_i32_0 = arith.constant 0 : i32
    %c0_i32_1 = arith.constant 0 : i32
    return %c0_i32, %c0_i32_0 : i32, i32
  }
  func.func @transform_7(%arg0: i32) -> (i32, i32) {
    %c0_i32 = arith.constant 0 : i32
    %c0_i32_0 = arith.constant 0 : i32
    return %arg0, %c0_i32 : i32, i32
  }
}

</mosaic_0001>

<bundles_post_ra>
// kernel: mlp_coder_forward.1
= control target key start
LH: loop header
LB: loop body
LE: loop exit
PB: predicated region body
PF: predicated region fallthrough
CT: control target
= control target key end

     0   :  { %s830_s24 = smov 0   ;;  %s903_s0 = inlined_call_operand.vmem [shape: f32[64,84], index: 0, kind: input, shape index: {}]   ;;  %s904_s1 = inlined_call_operand.vmem [shape: bf16[84,32], index: 1, kind: input, shape index: {}]   ;;  %s905_s2 = inlined_call_operand.vmem [shape: f32[1,32], index: 2, kind: input, shape index: {}]   ;;  %s906_s3 = inlined_call_operand.vmem [shape: bf16[32,64], index: 3, kind: input, shape index: {}]   ;;  %s907_s4 = inlined_call_operand.vmem [shape: f32[1,64], index: 4, kind: input, shape index: {}]   ;;  %s908_s5 = inlined_call_operand.vmem [shape: bf16[64,42], index: 5, kind: input, shape index: {}]   ;;  %s909_s6 = inlined_call_operand.vmem [shape: f32[1,42], index: 6, kind: input, shape index: {}]   ;;  %s910_s7 = inlined_call_operand.vmem [shape: f32[64,42], index: 7, kind: output, shape index: {}]  }
   0x1 LB: > { %s675_s25 = sadd.s32 4294967295, %s788_s24   ;;  %p679_p0 = scmp.ge.s32.totalorder %s788_s24, 1  ;;  %s788_s24 = sphi %s830_s24, %s17_s24  }
   0x2   : > { %p238_p1 = scmp.lt.s32.totalorder %s788_s24, 3 }
   0x4   : > { %p239_p2 = pnand %p679_p0, %p238_p1 }
   0x5   : > { %s680_s30 = sshll.u32 (!%p239_p2), %s675_s25, 2 }
   0x6   : > { %242 = sbr.rel (%p239_p2) target bundleno = 655 (0x28f), region = 48  ;;  %p271_p3 = scmp.lt.s32.totalorder (!%p239_p2), %s680_s30, 7 }
   0xb   : > { %v770_v0 = vld [vmem:[%s904_s1 + $0x28] ss:$0 sps:$4 sm:$0x33]   ;;  %vm347_vm0 = vcmask 1041408   ;;  %v771_v1 = vld [vmem:[%s904_s1 + $0x20] sm:$0xff]   ;;  %v772_v3 = vld [vmem:[%s904_s1 + $0x18] sm:$0xff]  }
   0xc   : > { %761 = vmatprep.subr.msk.bf16.mxu0 %vm347_vm0, %v770_v0  ;;  %v349_v2 = vsel %vm347_vm0, %v770_v0, 0  ;;  %s912_s30 = smov (!%p271_p3, %s680_s30), 7  ;;  %v773_v4 = vld [vmem:[%s904_s1 + $0x10] sm:$0xff]   ;;  %vm340_vm1 = vcmask 687104   ;;  %v774_v8 = vld [vmem:[%s904_s1 + $0x8] sm:$0xff]   ;;  %v775_v9 = vld [vmem:[%s904_s1] sm:$0xff]  }
   0xd   : > { %726 = vmatpush3.bf16.msra.mxu0 %v349_v2  ;;  %s681_s12 = sshll.u32 %s912_s30, 3  ;;  %v776_v13 = vld [vmem:[%s906_s3 + $0x8] sm:$0xff]   ;;  %v777_v14 = vld [vmem:[%s906_s3] sm:$0xff]   ;;  %v778_v15 = vld [vmem:[%s908_s5 + $0x18] sm:$0xff]   ;;  %vm437_vm6 = vcmask 261120   ;;  %vm546_vm11 = vcmask 523264  }
   0xe   : > { %727 = vmatprep.subr.bf16.mxu0 %v771_v1  ;;  %s274_s15 = scalar_lea.vmem %s903_s0, %s681_s12  ;;  %741 = vmatprep.subr.bf16.mxu1 %v776_v13  ;;  %v684_v17 = vld [vmem:[%s905_s2] ss:$0 sm:$0xff]  ;;  %v779_v35 = vld [vmem:[%s908_s5 + $0x10] sm:$0xff]   ;;  %v780_v36 = vld [vmem:[%s908_s5 + $0x8] sm:$0xff]   ;;  %s280_s20 = scalar_lea.vmem %s910_s7, %s681_s12  ;;  %vm614_vm13 = vcmask 343040  }
   0xf   : > { %v283_v5 = vld [vmem:[%s274_s15] sm:$0xff]  ;;  %v284_v6 = vld [vmem:[%s274_s15 + $0x8] sm:$0xff]  ;;  %v285_v10 = vld [vmem:[%s274_s15 + $0x10] sm:$0xff]  ;;  %742 = vmatpush3.bf16.msra.mxu1 %v776_v13 }
  0x10   : > { %v287_v7 = vpack.c.bf16 %v284_v6, %v283_v5  ;;  %v286_v11 = vld [vmem:[%s274_s15 + $0x18] sm:$0xff]  ;;  %743 = vmatprep.subr.bf16.mxu1 %v777_v14  ;;  %v781_v37 = vld [vmem:[%s908_s5] sm:$0xff]  }
  0x11   : > { %728 = vmatpush3.bf16.msra.mxu0 %v771_v1  ;;  %v288_v12 = vpack.c.bf16 %v286_v11, %v285_v10  ;;  %v693_v39 = vld [vmem:[%s907_s4] ss:$0 sm:$0xff] }
  0x12   : > { %729 = vmatprep.subr.bf16.mxu0 %v772_v3  ;;  %737 = vmatprep.mubr.msk.bf16.mxu0 %vm340_vm1, %v287_v7  ;;  %v698_v58 = vld [vmem:[%s909_s6] ss:$0 sm:$0xff] }
  0x13   : > { %744 = vmatpush3.bf16.msra.mxu1 %v777_v14 }
  0x14   : > { %749 = vmatprep.subr.bf16.mxu1 %v778_v15 }
  0x15   : > { %730 = vmatpush3.bf16.msra.mxu0 %v772_v3 }
  0x16   : > { %731 = vmatprep.subr.bf16.mxu0 %v773_v4 }
  0x19   : > { %732 = vmatpush3.bf16.msra.mxu0 %v773_v4 }
  0x1a   : > { %733 = vmatprep.subr.bf16.mxu0 %v774_v8 }
  0x1d   : > { %734 = vmatpush3.bf16.msra.mxu0 %v774_v8 }
  0x1e   : > { %735 = vmatprep.subr.bf16.mxu0 %v775_v9 }
  0x21   : > { %736 = vmatpush3.bf16.msra.mxu0 %v775_v9 }
  0x24   : > { %738 = vmatmul.mubr.msk.bf16.vlgmr.msra.gmra.mxu0 %vm340_vm1, %v288_v12 }
  0xe4   : > { %v739_v16 = vpop.f32.mrf.mxu0 }
  0xe5   : > { %v394_v20 = vadd.f32 %v739_v16, %v684_v17 }
  0xe6   : > { %v385_v18 = vpop.f32.mrf.mxu0 }
  0xe7   : > { %v386_v19 = vadd.f32 %v684_v17, %v385_v18  ;;  %v406_v27 = vmul.f32 0.05, %v394_v20  ;;  %vm402_vm4 = vcmp.gt.f32.partialorder %v394_v20, 0.0 }
  0xe8   : > { %v740_v21 = vpop.f32.mrf.mxu0 }
  0xe9   : > { %v397_v22 = vadd.f32 %v740_v21, %v684_v17  ;;  %v404_v24 = vmul.f32 0.05, %v386_v19  ;;  %vm400_vm3 = vcmp.gt.f32.partialorder %v386_v19, 0.0  ;;  %v410_v32 = vsel %vm402_vm4, %v394_v20, %v406_v27 }
  0xea   : > { %v388_v23 = vpop.f32.mrf.mxu0 }
  0xeb   : > { %vm403_vm2 = vcmp.gt.f32.partialorder %v397_v22, 0.0  ;;  %v407_v25 = vmul.f32 0.05, %v397_v22  ;;  %v389_v26 = vadd.f32 %v684_v17, %v388_v23  ;;  %v408_v30 = vsel %vm400_vm3, %v386_v19, %v404_v24 }
  0xed   : > { %v405_v28 = vmul.f32 0.05, %v389_v26  ;;  %vm401_vm5 = vcmp.gt.f32.partialorder %v389_v26, 0.0  ;;  %v411_v29 = vsel %vm403_vm2, %v397_v22, %v407_v25 }
  0xee   : > { %v413_v34 = vpack.c.bf16 %v411_v29, %v410_v32 }
  0xef   : > { %v409_v31 = vsel %vm401_vm5, %v389_v26, %v405_v28 }
  0xf0   : > { %v412_v33 = vpack.c.bf16 %v409_v31, %v408_v30 }
  0xf2   : > { %745 = vmatprep.mubr.msk.bf16.mxu1 %vm437_vm6, %v412_v33 }
  0xf3   : > { %746 = vmatmul.mubr.msk.bf16.vlgmr.msra.gmra.mxu1 %vm437_vm6, %v413_v34 }
  0xf4   : > { %750 = vmatpush3.bf16.msra.mxu1 %v778_v15 }
  0xf5   : > { %751 = vmatprep.subr.bf16.mxu1 %v779_v35 }
  0xf8   : > { %752 = vmatpush3.bf16.msra.mxu1 %v779_v35 }
  0xf9   : > { %753 = vmatprep.subr.bf16.mxu1 %v780_v36 }
  0xfc   : > { %754 = vmatpush3.bf16.msra.mxu1 %v780_v36 }
  0xfd   : > { %755 = vmatprep.subr.bf16.mxu1 %v781_v37 }
 0x100   : > { %756 = vmatpush3.bf16.msra.mxu1 %v781_v37 }
 0x1b3   : > { %v747_v38 = vpop.f32.mrf.mxu1 }
 0x1b4   : > { %v487_v42 = vadd.f32 %v747_v38, %v693_v39 }
 0x1b5   : > { %v478_v40 = vpop.f32.mrf.mxu1 }
 0x1b6   : > { %v479_v41 = vadd.f32 %v693_v39, %v478_v40  ;;  %v499_v49 = vmul.f32 0.05, %v487_v42  ;;  %vm495_vm9 = vcmp.gt.f32.partialorder %v487_v42, 0.0 }
 0x1b7   : > { %v748_v43 = vpop.f32.mrf.mxu1 }
 0x1b8   : > { %v490_v44 = vadd.f32 %v748_v43, %v693_v39  ;;  %v497_v46 = vmul.f32 0.05, %v479_v41  ;;  %vm493_vm8 = vcmp.gt.f32.partialorder %v479_v41, 0.0  ;;  %v503_v54 = vsel %vm495_vm9, %v487_v42, %v499_v49 }
 0x1b9   : > { %v481_v45 = vpop.f32.mrf.mxu1 }
 0x1ba   : > { %vm496_vm7 = vcmp.gt.f32.partialorder %v490_v44, 0.0  ;;  %v500_v47 = vmul.f32 0.05, %v490_v44  ;;  %v482_v48 = vadd.f32 %v693_v39, %v481_v45  ;;  %v501_v52 = vsel %vm493_vm8, %v479_v41, %v497_v46 }
 0x1bc   : > { %vm494_vm10 = vcmp.gt.f32.partialorder %v482_v48, 0.0  ;;  %v498_v50 = vmul.f32 0.05, %v482_v48  ;;  %v504_v51 = vsel %vm496_vm7, %v490_v44, %v500_v47 }
 0x1bd   : > { %v506_v56 = vpack.c.bf16 %v504_v51, %v503_v54 }
 0x1be   : > { %v502_v53 = vsel %vm494_vm10, %v482_v48, %v498_v50 }
 0x1bf   : > { %v505_v55 = vpack.c.bf16 %v502_v53, %v501_v52 }
 0x1c1   : > { %757 = vmatprep.mubr.msk.bf16.mxu1 %vm546_vm11, %v505_v55 }
 0x1c2   : > { %758 = vmatmul.mubr.msk.bf16.vlgmr.msra.gmra.mxu1 %vm546_vm11, %v506_v56 }
 0x282   : > { %v759_v57 = vpop.f32.mrf.mxu1 }
 0x283   : > { %v596_v61 = vadd.f32 %v759_v57, %v698_v58 }
 0x284   : > { %v587_v59 = vpop.f32.mrf.mxu1 }
 0x285   : > { %v588_v60 = vadd.f32 %v698_v58, %v587_v59  ;;  %v608_v4 = vmul.f32 0.05, %v596_v61  ;;  %vm604_vm14 = vcmp.gt.f32.partialorder %v596_v61, 0.0 }
 0x286   : > { %v760_v62 = vpop.f32.mrf.mxu1 }
 0x287   : > { %vm602_vm12 = vcmp.gt.f32.partialorder %v588_v60, 0.0  ;;  %v606_v63 = vmul.f32 0.05, %v588_v60  ;;  %v599_v0 = vadd.f32 %v760_v62, %v698_v58  ;;  %v612_v8 = vsel %vm604_vm14, %v596_v61, %v608_v4 }
 0x288   : > { %v590_v1 = vpop.f32.mrf.mxu1  ;;  %617 = vst.msk [vmem:[%s280_s20 + $0x10] sm:$0xff] %vm614_vm13, %v612_v8 }
 0x289   : > { %v610_v2 = vsel %vm602_vm12, %v588_v60, %v606_v63  ;;  %v591_v3 = vadd.f32 %v698_v58, %v590_v1  ;;  %v609_v5 = vmul.f32 0.05, %v599_v0  ;;  %vm605_vm0 = vcmp.gt.f32.partialorder %v599_v0, 0.0 }
 0x28a   : > { %615 = vst.msk [vmem:[%s280_s20] sm:$0xff] %vm614_vm13, %v610_v2 }
 0x28b   : > { %vm603_vm15 = vcmp.gt.f32.partialorder %v591_v3, 0.0  ;;  %v607_v6 = vmul.f32 0.05, %v591_v3  ;;  %v613_v9 = vsel %vm605_vm0, %v599_v0, %v609_v5 }
 0x28c   : > { %618 = vst.msk [vmem:[%s280_s20 + $0x18] sm:$0xff] %vm614_vm13, %v613_v9 }
 0x28d   : > { %v611_v7 = vsel %vm603_vm15, %v591_v3, %v607_v6 }
 0x28e   : > { %616 = vst.msk [vmem:[%s280_s20 + $0x8] sm:$0xff] %vm614_vm13, %v611_v7 }
 0x28f PF: > { %s17_s24 = sadd.s32 1, %s788_s24  }
 0x290   : > { %p14_p4 = scmp.ge.s32.totalorder %s17_s24, 4  }
 0x292   :  { %16 = sbr.rel (!%p14_p4) target bundleno = 1 (0x1), region = 78 }

</bundles_post_ra>
